<compile_context>
chip_gen: v6e
topology: v6e:2x2x1
jax: 0.10.0
libtpu: 0.0.40
codegen_flags: <defaults>
</compile_context>

<pallas_src>
import math
import jax
import jax.numpy as jnp
from jax.experimental import pallas as pl
from jax.experimental.pallas import tpu as pltpu


def _disc_matvec_kernel(z_ref, feat_ref, out_ref):
    # z_ref:    (1, H)   resident vector (constant block index across the grid)
    # feat_ref: (tm, H)  streaming row tile of `features`
    # out_ref:  (1, tm)  lane-dense output strip
    # out[0, r] = sum_h z[0, h] * feat[r, h]   (contract over last dim of both)
    out_ref[...] = jax.lax.dot_general(
        z_ref[...],
        feat_ref[...],
        dimension_numbers=(((1,), (1,)), ((), ())),
        preferred_element_type=jnp.float32,
    ).astype(out_ref.dtype)


def _round_up(x, m):
    return (x + m - 1) // m * m


def _pick_row_tile(n_rows, n_hidden, itemsize=4,
                   per_buffer_budget_bytes=8 * 1024 * 1024):
    """Largest multiple-of-128 row tile whose double-buffered features block fits
    the VMEM budget; clamped to [128, 2048] and not wildly larger than N."""
    tm = per_buffer_budget_bytes // max(1, n_hidden * itemsize)
    tm = max(128, min(2048, (tm // 128) * 128))
    tm = min(tm, max(128, _round_up(n_rows, 128)))
    # Prefer >= 2 grid steps so the parallel row axis can shard across the two
    # TensorCores on v7x; no-op for tiny problems (tm == 128).
    while tm > 128 and (n_rows + tm - 1) // tm < 2:
        tm = max(128, ((tm // 2) + 127) // 128 * 128)
    return tm


def discriminator_forward(features, weight, summary, *, tm=None):
    """features: (N, H), weight: (H, H), summary: (H,)  ->  (N,)."""
    N, H = features.shape
    assert weight.shape == (H, H)
    assert summary.shape == (H,)
    dtype = features.dtype

    # Hoisted once per call (plain JAX): z = W @ summary.  H^2 work / bytes,
    # negligible next to the N*H features stream, and it keeps the (H, H)
    # weight out of VMEM entirely (mandatory on v7x for large H).
    z_row = jnp.dot(
        weight.astype(jnp.float32),
        summary.astype(jnp.float32),
        preferred_element_type=jnp.float32,
    ).reshape(1, H).astype(dtype)

    if tm is None:
        tm = _pick_row_tile(N, H, itemsize=jnp.dtype(dtype).itemsize)

    n_pad = _round_up(N, tm)
    grid = n_pad // tm
    if n_pad != N:
        # Zero rows contribute zero dot-products; padded tail is sliced off below.
        features = jnp.pad(features, ((0, n_pad - N), (0, 0)))

    out = pl.pallas_call(
        _disc_matvec_kernel,
        out_shape=jax.ShapeDtypeStruct((1, n_pad), dtype),
        grid_spec=pltpu.PrefetchScalarGridSpec(
            num_scalar_prefetch=0,
            grid=(grid,),
            in_specs=[
                pl.BlockSpec((1, H), lambda i: (0, 0)),    # z: tiny, resident
                pl.BlockSpec((tm, H), lambda i: (i, 0)),   # features: streamed tiles
            ],
            out_specs=pl.BlockSpec((1, tm), lambda i: (0, i)),  # lane-dense strip
        ),
        compiler_params=pltpu.CompilerParams(
            dimension_semantics=("parallel",),
            vmem_limit_bytes=32 * 1024 * 1024,
        ),
    )(z_row, features)

    return out.reshape(n_pad)[:N]


def init_discriminator_weight(key, n_hidden, dtype=jnp.float32):
    """Deterministic re-implementation of Discriminator.reset_parameters:
    uniform(-1/sqrt(n_hidden), 1/sqrt(n_hidden)) on an (n_hidden, n_hidden) matrix."""
    bound = 1.0 / math.sqrt(n_hidden)
    return jax.random.uniform(
        key, (n_hidden, n_hidden), dtype=dtype, minval=-bound, maxval=bound
    )


if __name__ == "__main__":
    key = jax.random.PRNGKey(0)

    # Two sizes: the original toy case and one that exercises padding + a
    # multi-step parallel grid.
    for (n_nodes, n_hidden) in [(16, 32), (300, 64)]:
        k_w, k_f, k_s, key = jax.random.split(key, 4)
        weight = init_discriminator_weight(k_w, n_hidden)
        features = jax.random.normal(k_f, (n_nodes, n_hidden), dtype=jnp.float32)
        summary = jax.random.normal(k_s, (n_hidden,), dtype=jnp.float32)

        out = discriminator_forward(features, weight, summary)
        out = jax.block_until_ready(out)

        # Reference in plain JAX (same semantics as the PyTorch module).
        ref = features @ (weight @ summary)
        assert out.shape == (n_nodes,)
        assert jnp.allclose(out, ref, atol=1e-4, rtol=1e-4)

    print("KERNEL_OK")
</pallas_src>

<mosaic_0001>
module attributes {stable_mosaic.version = 11 : i64} {
  func.func @_disc_matvec_kernel(%arg0: i32, %arg1: memref<1x32xf32, #tpu.memory_space<vmem>>, %arg2: memref<128x32xf32, #tpu.memory_space<vmem>>, %arg3: memref<1x128xf32, #tpu.memory_space<vmem>>) attributes {dimension_semantics = [#tpu.dimension_semantics<parallel>], iteration_bounds = array<i64: 1>, scalar_prefetch = 0 : i64, scratch_operands = 0 : i64, tpu.core_type = #tpu.core_type<tc>, window_params = [{pipeline_mode = #tpu.pipeline_mode<synchronous>, transform_indices = @transform_0, window_bounds = array<i64: 1, 32>}, {transform_indices = @transform_1, window_bounds = array<i64: 128, 32>}, {transform_indices = @transform_2, window_bounds = array<i64: 1, 128>}]} {
    %c0 = arith.constant 0 : index
    %c0_0 = arith.constant 0 : index
    %0 = vector.load %arg1[%c0, %c0_0] : memref<1x32xf32, #tpu.memory_space<vmem>>, vector<1x32xf32>
    %c0_1 = arith.constant 0 : index
    %c0_2 = arith.constant 0 : index
    %1 = vector.load %arg2[%c0_1, %c0_2] : memref<128x32xf32, #tpu.memory_space<vmem>>, vector<128x32xf32>
    %cst = arith.constant dense<0.000000e+00> : vector<1x128xf32>
    %2 = tpu.matmul %0, %1, %cst {dimension_numbers = #tpu.dot_dimension_numbers<[1], [1], [0], [0], [0, 0, 1, 0], [], []>} : vector<1x32xf32>, vector<128x32xf32>, vector<1x128xf32> -> vector<1x128xf32>
    %c0_3 = arith.constant 0 : index
    %c0_4 = arith.constant 0 : index
    %3 = vector.load %arg3[%c0_3, %c0_4] : memref<1x128xf32, #tpu.memory_space<vmem>>, vector<1x128xf32>
    tpu.vector_store %arg3[%c0_3, %c0_4], %2 {strides = array<i32>} : memref<1x128xf32, #tpu.memory_space<vmem>>, vector<1x128xf32>,
    return
  }
  func.func @transform_0(%arg0: i32) -> (i32, i32) {
    %c0_i32 = arith.constant 0 : i32
    %c0_i32_0 = arith.constant 0 : i32
    %c0_i32_1 = arith.constant 0 : i32
    return %c0_i32, %c0_i32_0 : i32, i32
  }
  func.func @transform_1(%arg0: i32) -> (i32, i32) {
    %c0_i32 = arith.constant 0 : i32
    %c0_i32_0 = arith.constant 0 : i32
    return %arg0, %c0_i32 : i32, i32
  }
  func.func @transform_2(%arg0: i32) -> (i32, i32) {
    %c0_i32 = arith.constant 0 : i32
    %c0_i32_0 = arith.constant 0 : i32
    return %c0_i32, %arg0 : i32, i32
  }
}

</mosaic_0001>

<bundles_post_ra>
// kernel: tpu_custom_call.1
= control target key start
LH: loop header
LB: loop body
LE: loop exit
PB: predicated region body
PF: predicated region fallthrough
CT: control target
= control target key end

     0   :  { %vm29_vm0 = vcmask 261120   ;;  %v260_v1 = vmov 0.0   ;;  %vm261_vm1 = vmmov 0   ;;  %s349_s0 = inlined_call_operand.vmem [shape: f32[1,32], index: 0, kind: input, shape index: {}]   ;;  %s350_s1 = inlined_call_operand.vmem [shape: f32[128,32], index: 1, kind: input, shape index: {}]   ;;  %s351_s2 = inlined_call_operand.hbm [shape: f32[1,128], index: 2, kind: output, shape index: {}]  }
   0x1   :  { %v28_v0 = vld [vmem:[%s350_s1 + $0x78] sm:$0xff]  ;;  %200 = vmatprep.subr.mxu0 %v260_v1  ;;  %232 = vmatprep.mubr.msk.f32.mxu0 %vm261_vm1, %v260_v1  ;;  %v27_v2 = vld [vmem:[%s350_s1 + $0x70] sm:$0xff] }
   0x2   :  { %201 = vmatpush3.xpose.msk.msra.mxu0 %vm29_vm0, %v28_v0 }
   0x3   :  { %202 = vmatprep.subr.mxu0 %v260_v1 }
   0x4   :  { %7 = vsyncpa [#allocation3], 0  ;;  %v26_v3 = vld [vmem:[%s350_s1 + $0x68] sm:$0xff]  ;;  %v25_v4 = vld [vmem:[%s350_s1 + $0x60] sm:$0xff]  ;;  %s262_s15 = smov [#allocation2]  }
   0x5   :  { %v24_v5 = vld [vmem:[%s350_s1 + $0x58] sm:$0xff]  ;;  %v23_v6 = vld [vmem:[%s350_s1 + $0x50] sm:$0xff]  ;;  %v22_v7 = vld [vmem:[%s350_s1 + $0x48] sm:$0xff]  ;;  %s158_s16 = sshll.u32 %s262_s15, 4  ;;  %s159_s16 = int_to_ptr.vmem [resolvable:$true] %s158_s16 }
   0x6   :  { %203 = vmatpush3.xpose.msk.msra.mxu0 %vm29_vm0, %v27_v2  ;;  %v21_v8 = vld [vmem:[%s350_s1 + $0x40] sm:$0xff]  ;;  %v20_v9 = vld [vmem:[%s350_s1 + $0x38] sm:$0xff]  ;;  %v19_v10 = vld [vmem:[%s350_s1 + $0x30] sm:$0xff]  ;;  %s238_s17 = scalar_lea.vmem %s159_s16, 16  ;;  %s242_s18 = scalar_lea.vmem %s159_s16, 32 }
   0x7   :  { %204 = vmatprep.subr.mxu0 %v260_v1  ;;  %v18_v11 = vld [vmem:[%s350_s1 + $0x28] sm:$0xff]  ;;  %v17_v12 = vld [vmem:[%s350_s1 + $0x20] sm:$0xff]  ;;  %v16_v13 = vld [vmem:[%s350_s1 + $0x18] sm:$0xff]  ;;  %p239_p0 = scmp.ne.s32.totalorder %s159_s16, %s238_s17  ;;  %p243_p1 = scmp.lt.s32.totalorder %s159_s16, %s159_s16 }
   0x8   :  { %v15_v14 = vld [vmem:[%s350_s1 + $0x10] sm:$0xff]  ;;  %v14_v15 = vld [vmem:[%s350_s1 + $0x8] sm:$0xff]  ;;  %v13_v16 = vld [vmem:[%s350_s1] sm:$0xff]  ;;  %p244_p2 = scmp.lt.s32.totalorder %s242_s18, %s238_s17 }
   0x9   :  { %v12_v17 = vld [vmem:[%s349_s0] sm:$0x1] }
   0xa   :  { %205 = vmatpush3.xpose.msk.msra.mxu0 %vm29_vm0, %v26_v3  ;;  %p245_p3 = por %p244_p2, %p243_p1 }
   0xb   :  { %206 = vmatprep.subr.mxu0 %v260_v1 }
   0xc   :  { %p246_p4 = pnand %p245_p3, %p239_p0 }
   0xe   :  { %207 = vmatpush3.xpose.msk.msra.mxu0 %vm29_vm0, %v25_v4 }
   0xf   :  { %208 = vmatprep.subr.mxu0 %v260_v1 }
  0x12   :  { %209 = vmatpush3.xpose.msk.msra.mxu0 %vm29_vm0, %v24_v5 }
  0x13   :  { %210 = vmatprep.subr.mxu0 %v260_v1 }
  0x16   :  { %211 = vmatpush3.xpose.msk.msra.mxu0 %vm29_vm0, %v23_v6 }
  0x17   :  { %212 = vmatprep.subr.mxu0 %v260_v1 }
  0x1a   :  { %213 = vmatpush3.xpose.msk.msra.mxu0 %vm29_vm0, %v22_v7 }
  0x1b   :  { %214 = vmatprep.subr.mxu0 %v260_v1 }
  0x1e   :  { %215 = vmatpush3.xpose.msk.msra.mxu0 %vm29_vm0, %v21_v8 }
  0x1f   :  { %216 = vmatprep.subr.mxu0 %v260_v1 }
  0x22   :  { %217 = vmatpush3.xpose.msk.msra.mxu0 %vm29_vm0, %v20_v9 }
  0x23   :  { %218 = vmatprep.subr.mxu0 %v260_v1 }
  0x26   :  { %219 = vmatpush3.xpose.msk.msra.mxu0 %vm29_vm0, %v19_v10 }
  0x27   :  { %220 = vmatprep.subr.mxu0 %v260_v1 }
  0x2a   :  { %221 = vmatpush3.xpose.msk.msra.mxu0 %vm29_vm0, %v18_v11 }
  0x2b   :  { %222 = vmatprep.subr.mxu0 %v260_v1 }
  0x2e   :  { %223 = vmatpush3.xpose.msk.msra.mxu0 %vm29_vm0, %v17_v12 }
  0x2f   :  { %224 = vmatprep.subr.mxu0 %v260_v1 }
  0x32   :  { %225 = vmatpush3.xpose.msk.msra.mxu0 %vm29_vm0, %v16_v13 }
  0x33   :  { %226 = vmatprep.subr.mxu0 %v260_v1 }
  0x36   :  { %227 = vmatpush3.xpose.msk.msra.mxu0 %vm29_vm0, %v15_v14 }
  0x37   :  { %228 = vmatprep.subr.mxu0 %v260_v1 }
  0x3a   :  { %229 = vmatpush3.xpose.msk.msra.mxu0 %vm29_vm0, %v14_v15 }
  0x3b   :  { %230 = vmatprep.subr.mxu0 %v260_v1 }
  0x3e   :  { %231 = vmatpush3.xpose.msk.msra.mxu0 %vm29_vm0, %v13_v16 }
  0x41   :  { %233 = vmatmul.mubr.msk.f32.vlgmr.msra.gmra.mxu0 %vm29_vm0, %v12_v17 }
 0x101   :  { %v147_v18 = vpop.f32.mrf.mxu0 }
 0x102   :  { %151 = vst [vmem:[#allocation2] sm:$0x1] %v147_v18 }
 0x103   :  { %v234_v19 = vpop.f32.mrf.mxu0 }
 0x104   :  { %249 = shalt.err (!%p246_p4)
}
 0x105   :  { %161 = dma.vmem_to_hbm [thread:$0]  %s159_s16, 16, %s351_s2, [#allocation3]  }
 0x106   :  { %258 = dma.done.wait [#allocation3], 16  }
 0x107   :  { %259 = vsyncadd [#allocation3], 4294967280 }
 0x108   :  { %165 = vsyncpa [#allocation3], 1 }

</bundles_post_ra>
